<compile_context>
chip_gen: v6e
topology: v6e:2x2x1
jax: 0.10.0
libtpu: 0.0.40
codegen_flags: <defaults>
</compile_context>

<pallas_src>
import functools

import jax
import jax.numpy as jnp
from jax.experimental import pallas as pl
from jax.experimental.pallas import tpu as pltpu

EPS = 1e-5  # matches torch.nn.BatchNorm2d default


# ----------------------------------------------------------------------------
# In-kernel helpers
# ----------------------------------------------------------------------------
def _shifted_slabs(rows, N, H, WC):
    """rows: (N, H, WC) -> (N, H, 3*WC) = [row r-1 | row r | row r+1] per output
    row r, with zero rows standing in for the H padding (padding=1 conv)."""
    z = jnp.zeros((N, 1, WC), dtype=rows.dtype)
    up = jnp.concatenate([z, rows[:, : H - 1, :]], axis=1)   # input row r-1 (kh=0)
    dn = jnp.concatenate([rows[:, 1:, :], z], axis=1)        # input row r+1 (kh=2)
    return jnp.concatenate([up, rows, dn], axis=-1)          # lane-dense K concat


def _bn_relu(acc, avg_ref, gl_ref, bl_ref, inv_cnt):
    """Training-mode BatchNorm (batch stats, biased variance) + ReLU.

    acc: (N*H, W*C) f32 pre-BN conv output, lane index = w*C + c.
    One stacked (2, W*C) x (W*C, W*C) matmul both reduces the row-sums over W
    and broadcasts the per-channel result back to every lane.
    """
    s = jnp.sum(acc, axis=0, keepdims=True)                  # (1, WC) sum
    q = jnp.sum(acc * acc, axis=0, keepdims=True)            # (1, WC) sum of squares
    sq = jnp.concatenate([s, q], axis=0)                     # (2, WC)
    stats = jnp.dot(sq, avg_ref[...],
                    preferred_element_type=jnp.float32) * inv_cnt
    mean = stats[0:1, :]
    msq = stats[1:2, :]
    # Clamp guards the E[x^2]-E[x]^2 cancellation (review correctness note).
    var = jnp.maximum(msq - mean * mean, 0.0)
    scale = gl_ref[...] * jax.lax.rsqrt(var + EPS)
    shift = bl_ref[...] - mean * scale
    return jnp.maximum(acc * scale + shift, 0.0)


def _conv_bn_relu_x2_kernel(
    x_ref,     # (N, H, W*Cin)        bf16  lane-dense input rows (NHWC flattened)
    wb1_ref,   # (3*W*Cin,  W*Cmid)   bf16  kh-folded banded conv1 weights
    avg1_ref,  # (W*Cmid, W*Cmid)     f32   per-channel averaging/broadcast matrix
    gl1_ref,   # (1, W*Cmid)          f32   gamma1 tiled to lane layout
    bl1_ref,   # (1, W*Cmid)          f32   beta1 tiled to lane layout
    wb2_ref,   # (3*W*Cmid, W*Cout)   bf16  kh-folded banded conv2 weights
    avg2_ref,  # (W*Cout, W*Cout)     f32
    gl2_ref,   # (1, W*Cout)          f32
    bl2_ref,   # (1, W*Cout)          f32
    out_ref,   # (N, H, W*Cout)       bf16  lane-dense output
    *,
    N, H, W, Cin, Cmid, Cout,
):
    NH = N * H
    inv_cnt = 1.0 / float(N * H * W)

    # ---- conv1: single bf16 MXU matmul, all 9 taps + width zero-pad in K ----
    x = x_ref[...]                                            # (N, H, W*Cin) bf16
    xcat = _shifted_slabs(x, N, H, W * Cin).reshape(NH, 3 * W * Cin)
    acc1 = jnp.dot(xcat, wb1_ref[...],
                   preferred_element_type=jnp.float32)        # (NH, W*Cmid) f32

    # ---- BN1 + ReLU ----------------------------------------------------------
    h = _bn_relu(acc1, avg1_ref, gl1_ref, bl1_ref, inv_cnt)   # (NH, W*Cmid) f32

    # ---- conv2: cast intermediate to bf16 ONCE, same single-matmul structure -
    hb = h.astype(jnp.bfloat16).reshape(N, H, W * Cmid)
    hcat = _shifted_slabs(hb, N, H, W * Cmid).reshape(NH, 3 * W * Cmid)
    acc2 = jnp.dot(hcat, wb2_ref[...],
                   preferred_element_type=jnp.float32)        # (NH, W*Cout) f32

    # ---- BN2 + ReLU + full-lane bf16 store ------------------------------------
    y = _bn_relu(acc2, avg2_ref, gl2_ref, bl2_ref, inv_cnt)
    out_ref[...] = y.reshape(N, H, W * Cout).astype(out_ref.dtype)


# ----------------------------------------------------------------------------
# Host-side parameter preparation (hoisted out of the per-forward path;
# run once per weight update).
# ----------------------------------------------------------------------------
def _banded_weights(w_khkwcico, W):
    """(3, 3, Ci, Co) conv taps -> (3*W*Ci, W*Co) kh-folded block-banded matrix.

    Row index = kh*(W*Ci) + w_in*Ci + ci ; col index = w_out*Co + co.
    Band value = w[kh, w_in - w_out + 1, ci, co] when that kw lies in [0, 3),
    else 0 — i.e. all kw taps and the width zero-padding are folded into K.
    """
    KH, KW, Ci, Co = w_khkwcico.shape
    w_in = jnp.arange(W)[:, None]
    w_out = jnp.arange(W)[None, :]
    kw = w_in - w_out + 1                                      # (W, W)
    valid = ((kw >= 0) & (kw < KW)).astype(w_khkwcico.dtype)   # (W, W)
    kw_idx = jnp.clip(kw, 0, KW - 1)
    taps = w_khkwcico[:, kw_idx, :, :]                         # (KH, W, W, Ci, Co)
    taps = taps * valid[None, :, :, None, None]
    taps = jnp.transpose(taps, (0, 1, 3, 2, 4))                # (kh, w_in, ci, w_out, co)
    return taps.reshape(KH * W * Ci, W * Co)


def _channel_avg(W, C):
    """(W*C, W*C) matrix: lane row-sums -> per-channel sum broadcast to every lane."""
    return jnp.tile(jnp.eye(C, dtype=jnp.float32), (W, W))


def prepare_conv_block_params(w1_oihw, g1, b1, w2_oihw, g2, b2, W):
    """Precompute kernel-ready tensors from PyTorch-layout weights (OIHW)."""
    Cmid = w1_oihw.shape[0]
    Cout = w2_oihw.shape[0]

    w1_t = jnp.transpose(w1_oihw, (2, 3, 1, 0)).astype(jnp.float32)  # (3,3,Cin,Cmid)
    w2_t = jnp.transpose(w2_oihw, (2, 3, 1, 0)).astype(jnp.float32)  # (3,3,Cmid,Cout)
    wb1 = _banded_weights(w1_t, W).astype(jnp.bfloat16)               # (3*W*Cin,  W*Cmid)
    wb2 = _banded_weights(w2_t, W).astype(jnp.bfloat16)               # (3*W*Cmid, W*Cout)

    avg1 = _channel_avg(W, Cmid)
    avg2 = _channel_avg(W, Cout)
    gl1 = jnp.tile(g1.astype(jnp.float32), W).reshape(1, W * Cmid)
    bl1 = jnp.tile(b1.astype(jnp.float32), W).reshape(1, W * Cmid)
    gl2 = jnp.tile(g2.astype(jnp.float32), W).reshape(1, W * Cout)
    bl2 = jnp.tile(b2.astype(jnp.float32), W).reshape(1, W * Cout)

    return (wb1, avg1, gl1, bl1, wb2, avg2, gl2, bl2)


def _full_spec(shape):
    nd = len(shape)
    return pl.BlockSpec(shape, lambda i, _nd=nd: (0,) * _nd)


# ----------------------------------------------------------------------------
# Forward pass (jitted; weight prep stays outside)
# ----------------------------------------------------------------------------
@jax.jit
def conv_block_pallas(x_nchw, wb1, avg1, gl1, bl1, wb2, avg2, gl2, bl2):
    """x_nchw: (N, Cin, H, W) f32. Returns NCHW f32 (kernel computes/writes bf16)."""
    N, Cin, H, W = x_nchw.shape
    Cmid = gl1.shape[1] // W
    Cout = gl2.shape[1] // W

    # Lane-dense activation rows (N, H, W*Cin), bf16 MXU operand.
    x_rows = jnp.transpose(x_nchw, (0, 2, 3, 1)).reshape(N, H, W * Cin)
    x_rows = x_rows.astype(jnp.bfloat16)

    kernel = functools.partial(
        _conv_bn_relu_x2_kernel,
        N=N, H=H, W=W, Cin=Cin, Cmid=Cmid, Cout=Cout,
    )

    operands = (x_rows, wb1, avg1, gl1, bl1, wb2, avg2, gl2, bl2)
    out_rows = pl.pallas_call(
        kernel,
        grid=(1,),
        in_specs=[_full_spec(op.shape) for op in operands],
        out_specs=_full_spec((N, H, W * Cout)),
        out_shape=jax.ShapeDtypeStruct((N, H, W * Cout), jnp.bfloat16),
        compiler_params=pltpu.CompilerParams(
            dimension_semantics=("arbitrary",),
        ),
    )(*operands)

    # Back to PyTorch NCHW layout (f32 for comparison with the reference).
    return jnp.transpose(out_rows.reshape(N, H, W, Cout),
                         (0, 3, 1, 2)).astype(jnp.float32)


# ----------------------------------------------------------------------------
# Pure-JAX f32 reference (matches PyTorch ConvBlock.forward, training-mode BN)
# ----------------------------------------------------------------------------
def conv_block_reference(x_nchw, w1_oihw, g1, b1, w2_oihw, g2, b2):
    dn = ("NCHW", "OIHW", "NCHW")

    def bn_relu(y, g, b):
        mean = jnp.mean(y, axis=(0, 2, 3), keepdims=True)
        var = jnp.mean((y - mean) ** 2, axis=(0, 2, 3), keepdims=True)
        y = (y - mean) * jax.lax.rsqrt(var + EPS)
        y = y * g.reshape(1, -1, 1, 1) + b.reshape(1, -1, 1, 1)
        return jnp.maximum(y, 0.0)

    y = jax.lax.conv_general_dilated(
        x_nchw, w1_oihw, (1, 1), ((1, 1), (1, 1)), dimension_numbers=dn)
    y = bn_relu(y, g1, b1)
    y = jax.lax.conv_general_dilated(
        y, w2_oihw, (1, 1), ((1, 1), (1, 1)), dimension_numbers=dn)
    return bn_relu(y, g2, b2)


if __name__ == "__main__":
    # Small shapes consistent with the module: ConvBlock(in=4, out=8) on 2x4x16x16.
    N, Cin, Cmid, Cout, H, W = 2, 4, 8, 8, 16, 16

    key = jax.random.PRNGKey(0)
    kx, kw1, kw2 = jax.random.split(key, 3)

    x = jax.random.normal(kx, (N, Cin, H, W), dtype=jnp.float32)
    # Deterministic synthetic conv weights (PyTorch OIHW layout), no bias.
    w1 = jax.random.normal(kw1, (Cmid, Cin, 3, 3), dtype=jnp.float32) * 0.1
    w2 = jax.random.normal(kw2, (Cout, Cmid, 3, 3), dtype=jnp.float32) * 0.1
    # BatchNorm affine params at their PyTorch init values.
    g1 = jnp.ones((Cmid,), jnp.float32)
    b1 = jnp.zeros((Cmid,), jnp.float32)
    g2 = jnp.ones((Cout,), jnp.float32)
    b2 = jnp.zeros((Cout,), jnp.float32)

    # Weight prep happens ONCE (hoisted out of the per-call jitted forward).
    params = prepare_conv_block_params(w1, g1, b1, w2, g2, b2, W)

    out = jax.block_until_ready(conv_block_pallas(x, *params))
    ref = jax.block_until_ready(conv_block_reference(x, w1, g1, b1, w2, g2, b2))

    assert out.shape == (N, Cout, H, W), out.shape
    # bf16 MXU operands + bf16 output store (f32 accumulation / BN stats), so
    # compare against the f32 reference at a bf16-appropriate tolerance.
    assert jnp.allclose(out, ref, atol=6e-2, rtol=6e-2), (
        float(jnp.max(jnp.abs(out - ref))))
    print("KERNEL_OK")
</pallas_src>

<mosaic_0001>
module attributes {stable_mosaic.version = 11 : i64} {
  func.func @_conv_bn_relu_x2_kernel(%arg0: i32, %arg1: memref<2x16x64xbf16, #tpu.memory_space<vmem>>, %arg2: memref<192x128xbf16, #tpu.memory_space<vmem>>, %arg3: memref<128x128xf32, #tpu.memory_space<vmem>>, %arg4: memref<1x128xf32, #tpu.memory_space<vmem>>, %arg5: memref<1x128xf32, #tpu.memory_space<vmem>>, %arg6: memref<384x128xbf16, #tpu.memory_space<vmem>>, %arg7: memref<128x128xf32, #tpu.memory_space<vmem>>, %arg8: memref<1x128xf32, #tpu.memory_space<vmem>>, %arg9: memref<1x128xf32, #tpu.memory_space<vmem>>, %arg10: memref<2x16x128xbf16, #tpu.memory_space<vmem>>) attributes {dimension_semantics = [#tpu.dimension_semantics<arbitrary>], iteration_bounds = array<i64: 1>, scalar_prefetch = 0 : i64, scratch_operands = 0 : i64, tpu.core_type = #tpu.core_type<tc>, window_params = [{pipeline_mode = #tpu.pipeline_mode<synchronous>, transform_indices = @transform_0, window_bounds = array<i64: 2, 16, 64>}, {pipeline_mode = #tpu.pipeline_mode<synchronous>, transform_indices = @transform_1, window_bounds = array<i64: 192, 128>}, {pipeline_mode = #tpu.pipeline_mode<synchronous>, transform_indices = @transform_2, window_bounds = array<i64: 128, 128>}, {pipeline_mode = #tpu.pipeline_mode<synchronous>, transform_indices = @transform_3, window_bounds = array<i64: 1, 128>}, {pipeline_mode = #tpu.pipeline_mode<synchronous>, transform_indices = @transform_4, window_bounds = array<i64: 1, 128>}, {pipeline_mode = #tpu.pipeline_mode<synchronous>, transform_indices = @transform_5, window_bounds = array<i64: 384, 128>}, {pipeline_mode = #tpu.pipeline_mode<synchronous>, transform_indices = @transform_6, window_bounds = array<i64: 128, 128>}, {pipeline_mode = #tpu.pipeline_mode<synchronous>, transform_indices = @transform_7, window_bounds = array<i64: 1, 128>}, {pipeline_mode = #tpu.pipeline_mode<synchronous>, transform_indices = @transform_8, window_bounds = array<i64: 1, 128>}, {pipeline_mode = #tpu.pipeline_mode<synchronous>, transform_indices = @transform_9, window_bounds = array<i64: 2, 16, 128>}]} {
    %c0 = arith.constant 0 : index
    %c0_0 = arith.constant 0 : index
    %c0_1 = arith.constant 0 : index
    %0 = vector.load %arg1[%c0, %c0_0, %c0_1] : memref<2x16x64xbf16, #tpu.memory_space<vmem>>, vector<2x16x64xbf16>
    %cst = arith.constant 0.000000e+00 : bf16
    %1 = vector.broadcast %cst : bf16 to vector<2x1x64xbf16>
    %2 = vector.extract_strided_slice %0 {offsets = [0, 0, 0], sizes = [2, 15, 64], strides = [1, 1, 1]} : vector<2x16x64xbf16> to vector<2x15x64xbf16>
    %3 = tpu.concatenate %1, %2 in 1 : vector<2x1x64xbf16>, vector<2x15x64xbf16> -> vector<2x16x64xbf16>
    %4 = vector.extract_strided_slice %0 {offsets = [0, 1, 0], sizes = [2, 15, 64], strides = [1, 1, 1]} : vector<2x16x64xbf16> to vector<2x15x64xbf16>
    %5 = tpu.concatenate %4, %1 in 1 : vector<2x15x64xbf16>, vector<2x1x64xbf16> -> vector<2x16x64xbf16>
    %6 = tpu.concatenate %3, %0, %5 in 2 : vector<2x16x64xbf16>, vector<2x16x64xbf16>, vector<2x16x64xbf16> -> vector<2x16x192xbf16>
    %7 = vector.shape_cast %6 : vector<2x16x192xbf16> to vector<32x192xbf16>
    %c0_2 = arith.constant 0 : index
    %c0_3 = arith.constant 0 : index
    %8 = vector.load %arg2[%c0_2, %c0_3] : memref<192x128xbf16, #tpu.memory_space<vmem>>, vector<192x128xbf16>
    %cst_4 = arith.constant dense<0.000000e+00> : vector<32x128xf32>
    %9 = tpu.matmul %7, %8, %cst_4 {dimension_numbers = #tpu.dot_dimension_numbers<[1], [0], [0], [1], [0, 0, 1, 1], [], []>} : vector<32x192xbf16>, vector<192x128xbf16>, vector<32x128xf32> -> vector<32x128xf32>
    %cst_5 = arith.constant dense<0.000000e+00> : vector<128xf32>
    %10 = vector.multi_reduction <add>, %9, %cst_5 [0] : vector<32x128xf32> to vector<128xf32>
    %11 = vector.shape_cast %10 : vector<128xf32> to vector<1x128xf32>
    %12 = arith.mulf %9, %9 : vector<32x128xf32>
    %cst_6 = arith.constant dense<0.000000e+00> : vector<128xf32>
    %13 = vector.multi_reduction <add>, %12, %cst_6 [0] : vector<32x128xf32> to vector<128xf32>
    %14 = vector.shape_cast %13 : vector<128xf32> to vector<1x128xf32>
    %15 = tpu.concatenate %11, %14 in 0 : vector<1x128xf32>, vector<1x128xf32> -> vector<2x128xf32>
    %c0_7 = arith.constant 0 : index
    %c0_8 = arith.constant 0 : index
    %16 = vector.load %arg3[%c0_7, %c0_8] : memref<128x128xf32, #tpu.memory_space<vmem>>, vector<128x128xf32>
    %cst_9 = arith.constant dense<0.000000e+00> : vector<2x128xf32>
    %17 = tpu.matmul %15, %16, %cst_9 {dimension_numbers = #tpu.dot_dimension_numbers<[1], [0], [0], [1], [0, 0, 1, 1], [], []>} : vector<2x128xf32>, vector<128x128xf32>, vector<2x128xf32> -> vector<2x128xf32>
    %cst_10 = arith.constant 0.001953125 : f32
    %18 = vector.broadcast %cst_10 : f32 to vector<2x128xf32>
    %19 = arith.mulf %17, %18 : vector<2x128xf32>
    %20 = vector.extract_strided_slice %19 {offsets = [0, 0], sizes = [1, 128], strides = [1, 1]} : vector<2x128xf32> to vector<1x128xf32>
    %21 = vector.extract_strided_slice %19 {offsets = [1, 0], sizes = [1, 128], strides = [1, 1]} : vector<2x128xf32> to vector<1x128xf32>
    %22 = arith.mulf %20, %20 : vector<1x128xf32>
    %23 = arith.subf %21, %22 : vector<1x128xf32>
    %cst_11 = arith.constant 0.000000e+00 : f32
    %24 = vector.broadcast %cst_11 : f32 to vector<1x128xf32>
    %25 = arith.maximumf %23, %24 : vector<1x128xf32>
    %c0_12 = arith.constant 0 : index
    %c0_13 = arith.constant 0 : index
    %26 = vector.load %arg4[%c0_12, %c0_13] : memref<1x128xf32, #tpu.memory_space<vmem>>, vector<1x128xf32>
    %cst_14 = arith.constant 9.99999974E-6 : f32
    %27 = vector.broadcast %cst_14 : f32 to vector<1x128xf32>
    %28 = arith.addf %25, %27 : vector<1x128xf32>
    %29 = math.rsqrt %28 : vector<1x128xf32>
    %30 = arith.mulf %26, %29 : vector<1x128xf32>
    %c0_15 = arith.constant 0 : index
    %c0_16 = arith.constant 0 : index
    %31 = vector.load %arg5[%c0_15, %c0_16] : memref<1x128xf32, #tpu.memory_space<vmem>>, vector<1x128xf32>
    %32 = arith.mulf %20, %30 : vector<1x128xf32>
    %33 = arith.subf %31, %32 : vector<1x128xf32>
    %34 = vector.broadcast %30 : vector<1x128xf32> to vector<32x128xf32>
    %35 = arith.mulf %9, %34 : vector<32x128xf32>
    %36 = vector.broadcast %33 : vector<1x128xf32> to vector<32x128xf32>
    %37 = arith.addf %35, %36 : vector<32x128xf32>
    %cst_17 = arith.constant 0.000000e+00 : f32
    %38 = vector.broadcast %cst_17 : f32 to vector<32x128xf32>
    %39 = arith.maximumf %37, %38 : vector<32x128xf32>
    %40 = arith.truncf %39 : vector<32x128xf32> to vector<32x128xbf16>
    %41 = vector.shape_cast %40 : vector<32x128xbf16> to vector<2x16x128xbf16>
    %cst_18 = arith.constant 0.000000e+00 : bf16
    %42 = vector.broadcast %cst_18 : bf16 to vector<2x1x128xbf16>
    %43 = vector.extract_strided_slice %41 {offsets = [0, 0, 0], sizes = [2, 15, 128], strides = [1, 1, 1]} : vector<2x16x128xbf16> to vector<2x15x128xbf16>
    %44 = tpu.concatenate %42, %43 in 1 : vector<2x1x128xbf16>, vector<2x15x128xbf16> -> vector<2x16x128xbf16>
    %45 = vector.extract_strided_slice %41 {offsets = [0, 1, 0], sizes = [2, 15, 128], strides = [1, 1, 1]} : vector<2x16x128xbf16> to vector<2x15x128xbf16>
    %46 = tpu.concatenate %45, %42 in 1 : vector<2x15x128xbf16>, vector<2x1x128xbf16> -> vector<2x16x128xbf16>
    %47 = tpu.concatenate %44, %41, %46 in 2 : vector<2x16x128xbf16>, vector<2x16x128xbf16>, vector<2x16x128xbf16> -> vector<2x16x384xbf16>
    %48 = vector.shape_cast %47 : vector<2x16x384xbf16> to vector<32x384xbf16>
    %c0_19 = arith.constant 0 : index
    %c0_20 = arith.constant 0 : index
    %49 = vector.load %arg6[%c0_19, %c0_20] : memref<384x128xbf16, #tpu.memory_space<vmem>>, vector<384x128xbf16>
    %cst_21 = arith.constant dense<0.000000e+00> : vector<32x128xf32>
    %50 = tpu.matmul %48, %49, %cst_21 {dimension_numbers = #tpu.dot_dimension_numbers<[1], [0], [0], [1], [0, 0, 1, 1], [], []>} : vector<32x384xbf16>, vector<384x128xbf16>, vector<32x128xf32> -> vector<32x128xf32>
    %cst_22 = arith.constant dense<0.000000e+00> : vector<128xf32>
    %51 = vector.multi_reduction <add>, %50, %cst_22 [0] : vector<32x128xf32> to vector<128xf32>
    %52 = vector.shape_cast %51 : vector<128xf32> to vector<1x128xf32>
    %53 = arith.mulf %50, %50 : vector<32x128xf32>
    %cst_23 = arith.constant dense<0.000000e+00> : vector<128xf32>
    %54 = vector.multi_reduction <add>, %53, %cst_23 [0] : vector<32x128xf32> to vector<128xf32>
    %55 = vector.shape_cast %54 : vector<128xf32> to vector<1x128xf32>
    %56 = tpu.concatenate %52, %55 in 0 : vector<1x128xf32>, vector<1x128xf32> -> vector<2x128xf32>
    %c0_24 = arith.constant 0 : index
    %c0_25 = arith.constant 0 : index
    %57 = vector.load %arg7[%c0_24, %c0_25] : memref<128x128xf32, #tpu.memory_space<vmem>>, vector<128x128xf32>
    %cst_26 = arith.constant dense<0.000000e+00> : vector<2x128xf32>
    %58 = tpu.matmul %56, %57, %cst_26 {dimension_numbers = #tpu.dot_dimension_numbers<[1], [0], [0], [1], [0, 0, 1, 1], [], []>} : vector<2x128xf32>, vector<128x128xf32>, vector<2x128xf32> -> vector<2x128xf32>
    %cst_27 = arith.constant 0.001953125 : f32
    %59 = vector.broadcast %cst_27 : f32 to vector<2x128xf32>
    %60 = arith.mulf %58, %59 : vector<2x128xf32>
    %61 = vector.extract_strided_slice %60 {offsets = [0, 0], sizes = [1, 128], strides = [1, 1]} : vector<2x128xf32> to vector<1x128xf32>
    %62 = vector.extract_strided_slice %60 {offsets = [1, 0], sizes = [1, 128], strides = [1, 1]} : vector<2x128xf32> to vector<1x128xf32>
    %63 = arith.mulf %61, %61 : vector<1x128xf32>
    %64 = arith.subf %62, %63 : vector<1x128xf32>
    %cst_28 = arith.constant 0.000000e+00 : f32
    %65 = vector.broadcast %cst_28 : f32 to vector<1x128xf32>
    %66 = arith.maximumf %64, %65 : vector<1x128xf32>
    %c0_29 = arith.constant 0 : index
    %c0_30 = arith.constant 0 : index
    %67 = vector.load %arg8[%c0_29, %c0_30] : memref<1x128xf32, #tpu.memory_space<vmem>>, vector<1x128xf32>
    %cst_31 = arith.constant 9.99999974E-6 : f32
    %68 = vector.broadcast %cst_31 : f32 to vector<1x128xf32>
    %69 = arith.addf %66, %68 : vector<1x128xf32>
    %70 = math.rsqrt %69 : vector<1x128xf32>
    %71 = arith.mulf %67, %70 : vector<1x128xf32>
    %c0_32 = arith.constant 0 : index
    %c0_33 = arith.constant 0 : index
    %72 = vector.load %arg9[%c0_32, %c0_33] : memref<1x128xf32, #tpu.memory_space<vmem>>, vector<1x128xf32>
    %73 = arith.mulf %61, %71 : vector<1x128xf32>
    %74 = arith.subf %72, %73 : vector<1x128xf32>
    %75 = vector.broadcast %71 : vector<1x128xf32> to vector<32x128xf32>
    %76 = arith.mulf %50, %75 : vector<32x128xf32>
    %77 = vector.broadcast %74 : vector<1x128xf32> to vector<32x128xf32>
    %78 = arith.addf %76, %77 : vector<32x128xf32>
    %cst_34 = arith.constant 0.000000e+00 : f32
    %79 = vector.broadcast %cst_34 : f32 to vector<32x128xf32>
    %80 = arith.maximumf %78, %79 : vector<32x128xf32>
    %81 = vector.shape_cast %80 : vector<32x128xf32> to vector<2x16x128xf32>
    %82 = arith.truncf %81 : vector<2x16x128xf32> to vector<2x16x128xbf16>
    %c0_35 = arith.constant 0 : index
    %c0_36 = arith.constant 0 : index
    %c0_37 = arith.constant 0 : index
    %83 = vector.load %arg10[%c0_35, %c0_36, %c0_37] : memref<2x16x128xbf16, #tpu.memory_space<vmem>>, vector<2x16x128xbf16>
    tpu.vector_store %arg10[%c0_35, %c0_36, %c0_37], %82 {strides = array<i32>} : memref<2x16x128xbf16, #tpu.memory_space<vmem>>, vector<2x16x128xbf16>,
    return
  }
  func.func @transform_0(%arg0: i32) -> (i32, i32, i32) {
    %c0_i32 = arith.constant 0 : i32
    %c0_i32_0 = arith.constant 0 : i32
    %c0_i32_1 = arith.constant 0 : i32
    %c0_i32_2 = arith.constant 0 : i32
    return %c0_i32, %c0_i32_0, %c0_i32_1 : i32, i32, i32
  }
  func.func @transform_1(%arg0: i32) -> (i32, i32) {
    %c0_i32 = arith.constant 0 : i32
    %c0_i32_0 = arith.constant 0 : i32
    %c0_i32_1 = arith.constant 0 : i32
    return %c0_i32, %c0_i32_0 : i32, i32
  }
  func.func @transform_2(%arg0: i32) -> (i32, i32) {
    %c0_i32 = arith.constant 0 : i32
    %c0_i32_0 = arith.constant 0 : i32
    %c0_i32_1 = arith.constant 0 : i32
    return %c0_i32, %c0_i32_0 : i32, i32
  }
  func.func @transform_3(%arg0: i32) -> (i32, i32) {
    %c0_i32 = arith.constant 0 : i32
    %c0_i32_0 = arith.constant 0 : i32
    %c0_i32_1 = arith.constant 0 : i32
    return %c0_i32, %c0_i32_0 : i32, i32
  }
  func.func @transform_4(%arg0: i32) -> (i32, i32) {
    %c0_i32 = arith.constant 0 : i32
    %c0_i32_0 = arith.constant 0 : i32
    %c0_i32_1 = arith.constant 0 : i32
    return %c0_i32, %c0_i32_0 : i32, i32
  }
  func.func @transform_5(%arg0: i32) -> (i32, i32) {
    %c0_i32 = arith.constant 0 : i32
    %c0_i32_0 = arith.constant 0 : i32
    %c0_i32_1 = arith.constant 0 : i32
    return %c0_i32, %c0_i32_0 : i32, i32
  }
  func.func @transform_6(%arg0: i32) -> (i32, i32) {
    %c0_i32 = arith.constant 0 : i32
    %c0_i32_0 = arith.constant 0 : i32
    %c0_i32_1 = arith.constant 0 : i32
    return %c0_i32, %c0_i32_0 : i32, i32
  }
  func.func @transform_7(%arg0: i32) -> (i32, i32) {
    %c0_i32 = arith.constant 0 : i32
    %c0_i32_0 = arith.constant 0 : i32
    %c0_i32_1 = arith.constant 0 : i32
    return %c0_i32, %c0_i32_0 : i32, i32
  }
  func.func @transform_8(%arg0: i32) -> (i32, i32) {
    %c0_i32 = arith.constant 0 : i32
    %c0_i32_0 = arith.constant 0 : i32
    %c0_i32_1 = arith.constant 0 : i32
    return %c0_i32, %c0_i32_0 : i32, i32
  }
  func.func @transform_9(%arg0: i32) -> (i32, i32, i32) {
    %c0_i32 = arith.constant 0 : i32
    %c0_i32_0 = arith.constant 0 : i32
    %c0_i32_1 = arith.constant 0 : i32
    %c0_i32_2 = arith.constant 0 : i32
    return %c0_i32, %c0_i32_0, %c0_i32_1 : i32, i32, i32
  }
}

</mosaic_0001>

<bundles_post_ra>
// kernel: conv_block_pallas.1
= control target key start
LH: loop header
LB: loop body
LE: loop exit
PB: predicated region body
PF: predicated region fallthrough
CT: control target
= control target key end

     0   :  { %14 = vsyncpa [#allocation3], 0  ;;  %s1583_s0 = inlined_call_operand.vmem [shape: bf16[2,16,64], index: 0, kind: input, shape index: {}]   ;;  %s1584_s1 = inlined_call_operand.hbm [shape: bf16[192,128], index: 1, kind: input, shape index: {}]   ;;  %s1585_s2 = inlined_call_operand.vmem [shape: f32[128,128], index: 2, kind: input, shape index: {}]   ;;  %s1586_s3 = inlined_call_operand.vmem [shape: f32[1,128], index: 3, kind: input, shape index: {}]   ;;  %s1587_s4 = inlined_call_operand.vmem [shape: f32[1,128], index: 4, kind: input, shape index: {}]   ;;  %s1588_s5 = inlined_call_operand.vmem [shape: bf16[384,128], index: 5, kind: input, shape index: {}]   ;;  %s1589_s6 = inlined_call_operand.hbm [shape: f32[128,128], index: 6, kind: input, shape index: {}]   ;;  %s1590_s7 = inlined_call_operand.vmem [shape: f32[1,128], index: 7, kind: input, shape index: {}]   ;;  %s1591_s8 = inlined_call_operand.vmem [shape: f32[1,128], index: 8, kind: input, shape index: {}]   ;;  %s1592_s9 = inlined_call_operand.vmem [shape: bf16[2,16,128], index: 9, kind: output, shape index: {}]  }
   0x1   :  { %15 = vsyncpa [#allocation5], 0  ;;  %s1261_s30 = smov [#allocation2]  }
   0x2   :  { %s23_s10 = sshll.u32 %s1261_s30, 4  ;;  %s24_s10 = int_to_ptr.vmem [resolvable:$true] %s23_s10 }
   0x3   :  { %s1225_s11 = scalar_lea.vmem %s24_s10, 1536  ;;  %p1230_p1 = scmp.lt.s32.totalorder %s24_s10, %s24_s10 }
   0x4   :  { %p1226_p0 = scmp.ne.s32.totalorder %s24_s10, %s1225_s11  ;;  %p1231_p2 = scmp.lt.s32.totalorder %s1225_s11, %s1225_s11 }
   0x6   :  { %p1232_p3 = por %p1231_p2, %p1230_p1 }
   0x8   :  { %p1233_p4 = pnand %p1232_p3, %p1226_p0 }
   0xa   :  { %1236 = shalt.err (!%p1233_p4)
}
   0xb   :  { %s1262_s12 = smov 64   ;;  %s1263_s13 = smov 4  }
   0xc   :  { %29 = dma.hbm_to_vmem [thread:$0]  %s1584_s1, 1536, %s24_s10, [#allocation3], %s1262_s12, %s1262_s12, %s1263_s13  }
   0xd   :  { %s1264_s16 = smov [#allocation4]  }
   0xe   :  { %s43_s17 = sshll.u32 %s1264_s16, 4  ;;  %s44_s17 = int_to_ptr.vmem [resolvable:$true] %s43_s17 }
   0xf   :  { %s1245_s18 = scalar_lea.vmem %s44_s17, 2048  ;;  %p1250_p6 = scmp.lt.s32.totalorder %s44_s17, %s44_s17 }
  0x10   :  { %p1246_p5 = scmp.ne.s32.totalorder %s44_s17, %s1245_s18  ;;  %p1251_p7 = scmp.lt.s32.totalorder %s1245_s18, %s1245_s18 }
  0x12   :  { %p1252_p8 = por %p1251_p7, %p1250_p6 }
  0x14   :  { %p1253_p9 = pnand %p1252_p8, %p1246_p5 }
  0x16   :  { %1256 = shalt.err (!%p1253_p9)
}
  0x17   :  { %s1265_s19 = smov 128   ;;  %s1266_s20 = smov 8  }
  0x18   :  { %49 = dma.hbm_to_vmem [thread:$0]  %s1589_s6, 2048, %s44_s17, [#allocation5], %s1265_s19, %s1265_s19, %s1266_s20  }
  0x19   :  { %1257 = dma.done.wait [#allocation3], 1536  }
  0x1a   :  { %1258 = vsyncadd [#allocation3], 4294965760 }
  0x1b   :  { %1259 = dma.done.wait [#allocation5], 2048  }
  0x1c   :  { %1260 = vsyncadd [#allocation5], 4294965248  ;;  %v1267_v0 = vmov 0   ;;  %v1268_v1 = vmov 0.0   ;;  %v1175_v2 = vld [vmem:[%s1583_s0] sm:$0xff]   ;;  %v1336_v3 = vld [vmem:[%s1583_s0 + $0x8] sm:$0xff]  }
  0x1d   :  { %222 = vmatprep.subr.bf16.mxu0 %v1267_v0  ;;  %1075 = vmatprep.subr.mxu1 %v1268_v1  ;;  %vm102_vm0 = vcmask 1047552   ;;  %v1177_v4 = vld [vmem:[#allocation2 + $0x38] sm:$0xff]   ;;  %v76_v5 = vshrl.u32 %v1175_v2, 16  ;;  %vm103_vm1 = vsmask.f32 7424  ;;  %v1178_v6 = vld [vmem:[#allocation2 + $0x30] sm:$0xff]  }
  0x1e   :  { %107 = vrot.lane.b32.xlu0 %v1175_v2, %s1262_s12  ;;  %223 = vmatpush1.bf16.msra.mxu0 %v1177_v4  ;;  %v79_v8 = vshll.u32 %v1175_v2, 16  ;;  %vm1341_vm2 = vmand %vm102_vm0, %vm103_vm1  ;;  %v1179_v12 = vld [vmem:[#allocation2 + $0x28] sm:$0xff]   ;;  %vm111_vm3 = vcmask 523264   ;;  %v1180_v15 = vld [vmem:[#allocation2 + $0x20] sm:$0xff]   ;;  %v86_v25 = vshll.u32 %v1336_v3, 16  ;;  %vm91_vm4 = vcmask 1040384  }
  0x1f   :  { %v78_v7 = vrot.slane %v76_v5, 7  ;;  %224 = vmatprep.subr.bf16.mxu0 %v1267_v0  ;;  %v1181_v16 = vld [vmem:[#allocation2 + $0x18] sm:$0xff]   ;;  %v1182_v18 = vld [vmem:[#allocation2 + $0x10] sm:$0xff]   ;;  %v1183_v19 = vld [vmem:[#allocation2 + $0x8] sm:$0xff]   ;;  %vm92_vm5 = vsmask.f32 256 }
  0x20   :  { %v96_v9 = vrot.slane %v79_v8, 1  ;;  %v310_v17 = vld [vmem:[%s1585_s2 + $0x78] sm:$0xff]  ;;  %v1184_v20 = vld [vmem:[#allocation2] sm:$0xff]   ;;  %v1186_v22 = vld [vmem:[#allocation2 + $0x50] sm:$0xff]   ;;  %v83_v26 = vshrl.u32 %v1336_v3, 16  ;;  %v98_v27 = vrot.slane %v86_v25, 1 }
  0x21   :  { %v81_v11 = vor.u32 %v79_v8, %v78_v7  ;;  %1076 = vmatpush3.msra.mxu1 %v310_v17  ;;  %v1185_v21 = vld [vmem:[#allocation2 + $0x58] sm:$0xff]   ;;  %v1187_v23 = vld [vmem:[#allocation2 + $0x48] sm:$0xff]   ;;  %v1188_v24 = vld [vmem:[#allocation2 + $0x40] sm:$0xff]   ;;  %vm1269_vm7 = vmmov 0  }
  0x22   :  { %109 = vrot.lane.b32.xlu0 %v1336_v3, %s1262_s12  ;;  %225 = vmatpush1.bf16.msra.mxu0 %v1178_v6  ;;  %v97_v13 = vor.u32 %v96_v9, %v76_v5  ;;  %vm1355_vm6 = vmand %vm91_vm4, %vm92_vm5  ;;  %v99_v29 = vor.u32 %v98_v27, %v83_v26  ;;  %v85_v30 = vrot.slane %v83_v26, 7  ;;  %v309_v39 = vld [vmem:[%s1585_s2 + $0x70] sm:$0xff]  ;;  %v308_v40 = vld [vmem:[%s1585_s2 + $0x68] sm:$0xff] }
  0x23   :  { %226 = vmatprep.subr.bf16.mxu0 %v1267_v0  ;;  %1077 = vmatprep.subr.mxu1 %v1268_v1  ;;  %v94_v31 = vsel %vm1355_vm6, 0, %v81_v11  ;;  %v307_v41 = vld [vmem:[%s1585_s2 + $0x60] sm:$0xff]  ;;  %v306_v42 = vld [vmem:[%s1585_s2 + $0x58] sm:$0xff]  ;;  %v305_v43 = vld [vmem:[%s1585_s2 + $0x50] sm:$0xff] }
  0x24   :  { %v105_v14 = vsel %vm1341_vm2, %v97_v13, 0  ;;  %v106_v33 = vsel %vm1341_vm2, %v99_v29, 0  ;;  %v88_v34 = vor.u32 %v86_v25, %v85_v30  ;;  %1078 = vmatpush3.msra.mxu1 %v309_v39  ;;  %v304_v44 = vld [vmem:[%s1585_s2 + $0x48] sm:$0xff]  ;;  %v303_v45 = vld [vmem:[%s1585_s2 + $0x40] sm:$0xff]  ;;  %v302_v46 = vld [vmem:[%s1585_s2 + $0x38] sm:$0xff]  ;;  %1107 = vmatprep.mubr.msk.f32.mxu1 %vm1269_vm7, %v1268_v1 }
  0x25   :  { %958 = vmatprep.mubr.msk.bf16.mxu0 %vm111_vm3, %v105_v14  ;;  %1079 = vmatprep.subr.mxu1 %v1268_v1  ;;  %v301_v47 = vld [vmem:[%s1585_s2 + $0x30] sm:$0xff]  ;;  %v300_v48 = vld [vmem:[%s1585_s2 + $0x28] sm:$0xff]  ;;  %v299_v49 = vld [vmem:[%s1585_s2 + $0x20] sm:$0xff] }
  0x26   :  { %227 = vmatpush1.bf16.msra.mxu0 %v1179_v12  ;;  %v95_v37 = vsel %vm1355_vm6, 0, %v88_v34  ;;  %1080 = vmatpush3.msra.mxu1 %v308_v40  ;;  %v298_v50 = vld [vmem:[%s1585_s2 + $0x18] sm:$0xff]  ;;  %v297_v51 = vld [vmem:[%s1585_s2 + $0x10] sm:$0xff]  ;;  %v296_v52 = vld [vmem:[%s1585_s2 + $0x8] sm:$0xff] }
  0x27   :  { %228 = vmatprep.subr.bf16.mxu0 %v1267_v0  ;;  %1081 = vmatprep.subr.mxu1 %v1268_v1  ;;  %v295_v53 = vld [vmem:[%s1585_s2] sm:$0xff]  ;;  %v1191_v25 = vld [vmem:[%s1588_s5 + $0xb8] sm:$0xff]   ;;  %v1192_v26 = vld [vmem:[%s1588_s5 + $0x70] sm:$0xff]  }
  0x28   :  { %1082 = vmatpush3.msra.mxu1 %v307_v41  ;;  %v1193_v27 = vld [vmem:[%s1588_s5 + $0x30] sm:$0xff]   ;;  %v1195_v30 = vld [vmem:[%s1588_s5 + $0x68] sm:$0xff]   ;;  %v1199_v34 = vld [vmem:[%s1588_s5 + $0x20] sm:$0xff]  }
  0x29   :  { %1083 = vmatprep.subr.mxu1 %v1268_v1  ;;  %v1194_v29 = vld [vmem:[%s1588_s5 + $0xb0] sm:$0xff]   ;;  %v790_v10 = vld [vmem:[#allocation4 + $0x68] sm:$0xff]  ;;  %v788_v28 = vld [vmem:[#allocation4 + $0x58] sm:$0xff] }
  0x2a   :  { %229 = vmatpush1.bf16.msra.mxu0 %v1180_v15  ;;  %1084 = vmatpush3.msra.mxu1 %v306_v42  ;;  %v1204_v39 = vld [vmem:[%s1588_s5 + $0x50] sm:$0xff]   ;;  %v1207_v42 = vld [vmem:[%s1588_s5 + $0x48] sm:$0xff]  }
  0x2b   :  { %230 = vmatprep.subr.bf16.mxu0 %v1267_v0  ;;  %1085 = vmatprep.subr.mxu1 %v1268_v1  ;;  %v1205_v40 = vld [vmem:[%s1588_s5 + $0x10] sm:$0xff]  }
  0x2c   :  { %1086 = vmatpush3.msra.mxu1 %v305_v43  ;;  %v1206_v41 = vld [vmem:[%s1588_s5 + $0x90] sm:$0xff]   ;;  %v1208_v43 = vld [vmem:[%s1588_s5 + $0x8] sm:$0xff]  }
  0x2d   :  { %1087 = vmatprep.subr.mxu1 %v1268_v1 }
  0x2e   :  { %231 = vmatpush1.bf16.msra.mxu0 %v1181_v16  ;;  %1088 = vmatpush3.msra.mxu1 %v304_v44  ;;  %v1209_v44 = vld [vmem:[%s1588_s5 + $0x88] sm:$0xff]  }
  0x2f   :  { %232 = vmatprep.subr.bf16.mxu0 %v1267_v0  ;;  %1089 = vmatprep.subr.mxu1 %v1268_v1 }
  0x30   :  { %1090 = vmatpush3.msra.mxu1 %v303_v45  ;;  %v1210_v45 = vld [vmem:[%s1588_s5 + $0x40] sm:$0xff]  }
  0x31   :  { %1091 = vmatprep.subr.mxu1 %v1268_v1 }
  0x32   :  { %233 = vmatpush1.bf16.msra.mxu0 %v1182_v18  ;;  %1092 = vmatpush3.msra.mxu1 %v302_v46  ;;  %v1211_v46 = vld [vmem:[%s1588_s5] sm:$0xff]  }
  0x33   :  { %234 = vmatprep.subr.bf16.mxu0 %v1267_v0  ;;  %1093 = vmatprep.subr.mxu1 %v1268_v1 }
  0x34   :  { %1094 = vmatpush3.msra.mxu1 %v301_v47  ;;  %v1212_v47 = vld [vmem:[%s1588_s5 + $0x80] sm:$0xff]  }
  0x35   :  { %1095 = vmatprep.subr.mxu1 %v1268_v1 }
  0x36   :  { %235 = vmatpush1.bf16.msra.mxu0 %v1183_v19  ;;  %1096 = vmatpush3.msra.mxu1 %v300_v48 }
  0x37   :  { %236 = vmatprep.subr.bf16.mxu0 %v1267_v0  ;;  %1097 = vmatprep.subr.mxu1 %v1268_v1 }
  0x38   :  { %1098 = vmatpush3.msra.mxu1 %v299_v49 }
  0x39   :  { %1099 = vmatprep.subr.mxu1 %v1268_v1 }
  0x3a   :  { %237 = vmatpush1.bf16.msra.mxu0 %v1184_v20  ;;  %1100 = vmatpush3.msra.mxu1 %v298_v50 }
  0x3b   :  { %246 = vmatprep.subr.bf16.mxu0 %v1267_v0  ;;  %1101 = vmatprep.subr.mxu1 %v1268_v1 }
  0x3c   :  { %1102 = vmatpush3.msra.mxu1 %v297_v51 }
  0x3d   :  { %1103 = vmatprep.subr.mxu1 %v1268_v1 }
  0x3e   :  { %247 = vmatpush2.bf16.msra.mxu0 %v1185_v21  ;;  %1104 = vmatpush3.msra.mxu1 %v296_v52 }
  0x3f   :  { %248 = vmatprep.subr.bf16.mxu0 %v1267_v0  ;;  %1105 = vmatprep.subr.mxu1 %v1268_v1 }
  0x40   :  { %1106 = vmatpush3.msra.mxu1 %v295_v53 }
  0x42   :  { %249 = vmatpush2.bf16.msra.mxu0 %v1186_v22 }
  0x43   :  { %250 = vmatprep.subr.bf16.mxu0 %v1267_v0 }
  0x46   :  { %251 = vmatpush2.bf16.msra.mxu0 %v1187_v23  ;;  %v1189_v23 = vld [vmem:[%s1588_s5 + $0x78] sm:$0xff]  }
  0x47   :  { %252 = vmatprep.subr.bf16.mxu0 %v1267_v0  ;;  %1020 = vmatprep.subr.bf16.mxu1 %v1189_v23 }
  0x4a   :  { %253 = vmatpush2.bf16.msra.mxu0 %v1188_v24  ;;  %v1190_v24 = vld [vmem:[%s1588_s5 + $0x38] sm:$0xff]  }
  0x4b   :  { %1110 = vmatprep.subr.bf16.mxu0 %v1191_v25 }
  0x90   :  { %v108_v32 = vpop.permute.xlu0 %107 }
  0x91   :  { %v114_v35 = vsel %vm111_vm3, %v94_v31, %v108_v32  ;;  %v1196_v31 = vld [vmem:[%s1588_s5 + $0x28] sm:$0xff]  }
  0x92   :  { %255 = vmatmul.mubr.bf16.vlgmr.msra.gmra.mxu0 %v114_v35  ;;  %v1197_v32 = vld [vmem:[%s1588_s5 + $0xa8] sm:$0xff]   ;;  %v1200_v35 = vld [vmem:[%s1588_s5 + $0xa0] sm:$0xff]  }
  0x93   :  { %959 = vmatprep.mubr.msk.bf16.mxu0 %vm111_vm3, %v106_v33  ;;  %1111 = vmatpush3.bf16.msra.mxu0 %v1191_v25  ;;  %v1198_v33 = vld [vmem:[%s1588_s5 + $0x60] sm:$0xff]  }
  0x94   :  { %v110_v36 = vpop.permute.xlu0 %109  ;;  %1112 = vmatprep.subr.bf16.mxu0 %v1194_v29 }
  0x95   :  { %v118_v38 = vsel %vm111_vm3, %v95_v37, %v110_v36  ;;  %v1201_v36 = vld [vmem:[%s1588_s5 + $0x58] sm:$0xff]  }
  0x96   :  { %v1202_v37 = vld [vmem:[%s1588_s5 + $0x18] sm:$0xff]  }
  0x97   :  { %1113 = vmatpush3.bf16.msra.mxu0 %v1194_v29 }
  0x98   :  { %1114 = vmatprep.subr.bf16.mxu0 %v1197_v32 }
  0x9a   :  { %263 = vmatmul.mubr.bf16.gmra.mxu0 %v118_v38  ;;  %v1203_v38 = vld [vmem:[%s1588_s5 + $0x98] sm:$0xff]  }
  0x9b   :  { %1115 = vmatpush3.bf16.msra.mxu0 %v1197_v32 }
  0x9c   :  { %1116 = vmatprep.subr.bf16.mxu0 %v1200_v35 }
  0x9f   :  { %1117 = vmatpush3.bf16.msra.mxu0 %v1200_v35 }
  0xa0   :  { %1118 = vmatprep.subr.bf16.mxu0 %v1203_v38 }
  0xa3   :  { %1119 = vmatpush3.bf16.msra.mxu0 %v1203_v38 }
  0xa4   :  { %1120 = vmatprep.subr.bf16.mxu0 %v1206_v41 }
  0xa7   :  { %1121 = vmatpush3.bf16.msra.mxu0 %v1206_v41 }
  0xa8   :  { %1122 = vmatprep.subr.bf16.mxu0 %v1209_v44 }
  0xab   :  { %1123 = vmatpush3.bf16.msra.mxu0 %v1209_v44  ;;  %v791_v44 = vld [vmem:[#allocation4 + $0x70] sm:$0xff] }
  0xac   :  { %1124 = vmatprep.subr.bf16.mxu0 %v1212_v47 }
  0xaf   :  { %1125 = vmatpush3.bf16.msra.mxu0 %v1212_v47  ;;  %v786_v47 = vld [vmem:[#allocation4 + $0x48] sm:$0xff] }
 0x152   :  { %v1429_v54 = vpop.f32.mrf.mxu0 }
 0x153   :  { %v280_v60 = vmul.f32 %v1429_v54, %v1429_v54 }
 0x154   :  { %v258_v55 = vpop.f32.mrf.mxu0 }
 0x156   :  { %v1431_v56 = vpop.f32.mrf.mxu0 }
 0x157   :  { %v281_v58 = vmul.f32 %v1431_v56, %v1431_v56  ;;  %v271_v61 = vadd.f32 %v1431_v56, %v1429_v54 }
 0x158   :  { %v261_v57 = vpop.f32.mrf.mxu0 }
 0x159   :  { %v284_v0 = vadd.f32 %v281_v58, %v280_v60  ;;  %v1270_v58 = vmov 1966171168  }
 0x15a   :  { %v1435_v59 = vpop.f32.mrf.mxu0  ;;  %v393_v60 = vunpack.c.l.s4 %v1270_v58  ;;  %v777_v58 = vld [vmem:[#allocation4] sm:$0xff] }
 0x15b   :  { %v282_v62 = vmul.f32 %v1435_v59, %v1435_v59  ;;  %v272_v2 = vadd.f32 %v271_v61, %v1435_v59  ;;  %v395_v61 = vlaneseq }
 0x15c   :  { %v266_v63 = vpop.f32.mrf.mxu0 }
 0x15d   :  { %v285_v4 = vadd.f32 %v284_v0, %v282_v62  ;;  %v394_v62 = vunpack.c.0.s8 %v393_v60  ;;  %v396_v63 = vshrl.u32 %v395_v61, 7 }
 0x15e   :  { %v1444_v3 = vpop.f32.mrf.mxu0 }
 0x15f   :  { %v273_v5 = vadd.f32 %v272_v2, %v1444_v3  ;;  %v283_v6 = vmul.f32 %v1444_v3, %v1444_v3  ;;  %v1523_v0 = vsub.s32 %v394_v62, %v396_v63 }
 0x160   :  { %v269_v7 = vpop.f32.mrf.mxu0 }
 0x161   :  { %v274_v8 = vrot.slane %v273_v5, 4  ;;  %v286_v9 = vadd.f32 %v285_v4, %v283_v6  ;;  %v388_v6 = vld [vmem:[%s1586_s3] sm:$0x1] }
 0x163   :  { %v275_v11 = vadd.f32 %v274_v8, %v273_v5  ;;  %v287_v12 = vrot.slane %v286_v9, 4  ;;  %v1530_v8 = vsub.s32 0, %v396_v63 }
 0x165   :  { %v276_v13 = vrot.slane %v275_v11, 2  ;;  %v288_v14 = vadd.f32 %v287_v12, %v286_v9 }
 0x167   :  { %v277_v15 = vadd.f32 %v276_v13, %v275_v11  ;;  %v289_v16 = vrot.slane %v288_v14, 2  ;;  %v409_v11 = vld [vmem:[%s1587_s4] sm:$0x1] }
 0x169   :  { %v278_v17 = vrot.slane %v277_v15, 1  ;;  %v290_v18 = vadd.f32 %v289_v16, %v288_v14 }
 0x16b   :  { %v291_v19 = vrot.slane %v290_v18, 1  ;;  %v279_v20 = vadd.f32 %v278_v17, %v277_v15 }
 0x16d   :  { %v292_v21 = vadd.f32 %v291_v19, %v290_v18 }
 0x16f   :  { %v294_v22 = vsel %vm91_vm4, %v279_v20, %v292_v21 }
 0x170   :  { %1108 = vmatmul.mubr.f32.vlgmr.msra.gmra.mxu1 %v294_v22 }
 0x171   :  { %1021 = vmatpush3.bf16.msra.mxu1 %v1190_v24 }
 0x172   :  { %1022 = vmatprep.subr.bf16.mxu1 %v1192_v26 }
 0x175   :  { %1023 = vmatpush3.bf16.msra.mxu1 %v1193_v27 }
 0x176   :  { %1024 = vmatprep.subr.bf16.mxu1 %v1195_v30 }
 0x179   :  { %1025 = vmatpush3.bf16.msra.mxu1 %v1196_v31 }
 0x17a   :  { %1026 = vmatprep.subr.bf16.mxu1 %v1198_v33 }
 0x17d   :  { %1027 = vmatpush3.bf16.msra.mxu1 %v1199_v34 }
 0x17e   :  { %1028 = vmatprep.subr.bf16.mxu1 %v1201_v36 }
 0x181   :  { %1029 = vmatpush3.bf16.msra.mxu1 %v1202_v37 }
 0x182   :  { %1030 = vmatprep.subr.bf16.mxu1 %v1204_v39 }
 0x185   :  { %1031 = vmatpush3.bf16.msra.mxu1 %v1205_v40 }
 0x186   :  { %1032 = vmatprep.subr.bf16.mxu1 %v1207_v42 }
 0x189   :  { %1033 = vmatpush3.bf16.msra.mxu1 %v1208_v43  ;;  %v792_v43 = vld [vmem:[#allocation4 + $0x78] sm:$0xff] }
 0x18a   :  { %1034 = vmatprep.subr.bf16.mxu1 %v1210_v45  ;;  %v789_v45 = vld [vmem:[#allocation4 + $0x60] sm:$0xff] }
 0x18d   :  { %1035 = vmatpush3.bf16.msra.mxu1 %v1211_v46  ;;  %v787_v46 = vld [vmem:[#allocation4 + $0x50] sm:$0xff] }
 0x18e   :  { %1130 = vmatprep.subr.mxu1 %v1268_v1 }
 0x230   :  { %v377_v48 = vpop.f32.mrf.mxu1 }
 0x231   :  { %v381_v49 = vmul.f32 0.001953125, %v377_v48  ;;  %v785_v48 = vld [vmem:[#allocation4 + $0x40] sm:$0xff] }
 0x232   :  { %v1109_v50 = vpop.f32.mrf.mxu1 }
 0x233   :  { %v382_v51 = vmul.f32 %v381_v49, %v381_v49  ;;  %v783_v50 = vld [vmem:[#allocation4 + $0x30] sm:$0xff] }
 0x235   :  { %v384_v52 = vrot.slane %v382_v51, 7  ;;  %v782_v51 = vld [vmem:[#allocation4 + $0x28] sm:$0xff] }
 0x237   :  { %v386_v53 = vsub.f32 %v381_v49, %v384_v52  ;;  %v781_v52 = vld [vmem:[#allocation4 + $0x20] sm:$0xff] }
 0x239   :  { %v387_v55 = vmax.f32 %v386_v53, 0.0  ;;  %v780_v53 = vld [vmem:[#allocation4 + $0x18] sm:$0xff] }
 0x23b   :  { %v389_v57 = vadd.f32 1e-05, %v387_v55  ;;  %v779_v55 = vld [vmem:[#allocation4 + $0x10] sm:$0xff] }
 0x23d   :  { %1213 = vrsqrt.f32 %v389_v57  ;;  %v778_v57 = vld [vmem:[#allocation4 + $0x8] sm:$0xff] }
 0x24a   :  { %v1214_v2 = vpop.eup %1213 }
 0x24b   :  { %v398_v4 = vrot.slane %v1214_v2, %v1523_v0 }
 0x24d   :  { %v399_v5 = vcombine.high %v398_v4, %v398_v4 }
 0x24f   :  { %v406_v7 = vrot.slane %v399_v5, %v1523_v0 }
 0x251   :  { %v408_v9 = vmul.f32 %v406_v7, %v388_v6 }
 0x253   :  { %v410_v12 = vmul.f32 %v408_v9, %v381_v49  ;;  %v416_v13 = vrot.slane %v408_v9, %v1530_v8  ;;  %v784_v49 = vld [vmem:[#allocation4 + $0x38] sm:$0xff] }
 0x255   :  { %v411_v14 = vsub.f32 %v409_v11, %v410_v12  ;;  %v418_v15 = vmul.f32 %v416_v13, %v1429_v54  ;;  %v419_v17 = vmul.f32 %v416_v13, %v1431_v56  ;;  %v420_v18 = vmul.f32 %v416_v13, %v1435_v59 }
 0x256   :  { %v421_v19 = vmul.f32 %v416_v13, %v1444_v3 }
 0x257   :  { %v426_v16 = vrot.slane %v411_v14, %v1530_v8 }
 0x259   :  { %v428_v20 = vadd.f32 %v426_v16, %v418_v15  ;;  %v429_v21 = vadd.f32 %v426_v16, %v419_v17  ;;  %v430_v22 = vadd.f32 %v426_v16, %v420_v18  ;;  %v431_v23 = vadd.f32 %v426_v16, %v421_v19 }
 0x25b   :  { %v432_v24 = vmax.f32 %v428_v20, 0.0  ;;  %v433_v25 = vmax.f32 %v429_v21, 0.0  ;;  %v434_v26 = vmax.f32 %v430_v22, 0.0  ;;  %v435_v27 = vmax.f32 %v431_v23, 0.0 }
 0x25d   :  { %v436_v29 = vpack.c.bf16 %v433_v25, %v432_v24  ;;  %v437_v30 = vpack.c.bf16 %v435_v27, %v434_v26 }
 0x25f   :  { %v439_v31 = vshrl.u32 %v436_v29, 16  ;;  %688 = vmatprep.mubr.bf16.mxu1 %v436_v29  ;;  %v442_v54 = vshll.u32 %v436_v29, 16  ;;  %v449_v32 = vshll.u32 %v437_v30, 16  ;;  %v446_v34 = vshrl.u32 %v437_v30, 16 }
 0x261   :  { %v441_v33 = vrot.slane %v439_v31, 7  ;;  %v456_v56 = vrot.slane %v442_v54, 1  ;;  %v458_v59 = vrot.slane %v449_v32, 1  ;;  %v448_v40 = vrot.slane %v446_v34, 7 }
 0x263   :  { %v444_v35 = vor.u32 %v442_v54, %v441_v33  ;;  %v457_v3 = vor.u32 %v456_v56, %v439_v31  ;;  %v459_v36 = vor.u32 %v458_v59, %v446_v34  ;;  %v451_v41 = vor.u32 %v449_v32, %v448_v40 }
 0x265   :  { %v454_v37 = vsel %vm1355_vm6, 0, %v444_v35  ;;  %v462_v38 = vsel %vm1341_vm2, %v457_v3, 0  ;;  %v463_v39 = vsel %vm1341_vm2, %v459_v36, 0  ;;  %v455_v42 = vsel %vm1355_vm6, 0, %v451_v41 }
 0x266   :  { %689 = vmatmul.mubr.bf16.vlgmr.msra.gmra.mxu1 %v454_v37  ;;  %1126 = vmatprep.mubr.bf16.mxu0 %v462_v38 }
 0x267   :  { %696 = vmatprep.mubr.bf16.mxu1 %v437_v30  ;;  %1127 = vmatmul.mubr.bf16.vlgmr.msra.gmra.mxu0 %v463_v39 }
 0x268   :  { %1131 = vmatpush3.msra.mxu1 %v792_v43 }
 0x269   :  { %1132 = vmatprep.subr.mxu1 %v1268_v1 }
 0x26a   :  { %1133 = vmatpush3.msra.mxu1 %v791_v44 }
 0x26b   :  { %1134 = vmatprep.subr.mxu1 %v1268_v1 }
 0x26c   :  { %1135 = vmatpush3.msra.mxu1 %v790_v10 }
 0x26d   :  { %1136 = vmatprep.subr.mxu1 %v1268_v1 }
 0x26e   :  { %697 = vmatmul.mubr.bf16.gmra.mxu1 %v455_v42 }
 0x26f   :  { %1162 = vmatprep.mubr.msk.f32.mxu1 %vm1269_vm7, %v1268_v1  ;;  %1137 = vmatpush3.msra.mxu1 %v789_v45 }
 0x270   :  { %1138 = vmatprep.subr.mxu1 %v1268_v1 }
 0x271   :  { %1139 = vmatpush3.msra.mxu1 %v788_v28 }
 0x272   :  { %1140 = vmatprep.subr.mxu1 %v1268_v1 }
 0x273   :  { %1141 = vmatpush3.msra.mxu1 %v787_v46 }
 0x274   :  { %1142 = vmatprep.subr.mxu1 %v1268_v1 }
 0x275   :  { %1143 = vmatpush3.msra.mxu1 %v786_v47 }
 0x276   :  { %1144 = vmatprep.subr.mxu1 %v1268_v1 }
 0x277   :  { %1145 = vmatpush3.msra.mxu1 %v785_v48 }
 0x278   :  { %1146 = vmatprep.subr.mxu1 %v1268_v1 }
 0x279   :  { %1147 = vmatpush3.msra.mxu1 %v784_v49  ;;  %v870_v49 = vld [vmem:[%s1590_s7] sm:$0x1] }
 0x27a   :  { %1148 = vmatprep.subr.mxu1 %v1268_v1 }
 0x27b   :  { %1149 = vmatpush3.msra.mxu1 %v783_v50 }
 0x27c   :  { %1150 = vmatprep.subr.mxu1 %v1268_v1 }
 0x27d   :  { %1151 = vmatpush3.msra.mxu1 %v782_v51 }
 0x27e   :  { %1152 = vmatprep.subr.mxu1 %v1268_v1 }
 0x27f   :  { %1153 = vmatpush3.msra.mxu1 %v781_v52  ;;  %v891_v52 = vld [vmem:[%s1591_s8] sm:$0x1] }
 0x280   :  { %1154 = vmatprep.subr.mxu1 %v1268_v1 }
 0x281   :  { %1155 = vmatpush3.msra.mxu1 %v780_v53 }
 0x282   :  { %1156 = vmatprep.subr.mxu1 %v1268_v1 }
 0x283   :  { %1157 = vmatpush3.msra.mxu1 %v779_v55 }
 0x284   :  { %1158 = vmatprep.subr.mxu1 %v1268_v1 }
 0x285   :  { %1159 = vmatpush3.msra.mxu1 %v778_v57 }
 0x286   :  { %1160 = vmatprep.subr.mxu1 %v1268_v1 }
 0x287   :  { %1161 = vmatpush3.msra.mxu1 %v777_v58 }
 0x326   :  { %v1036_v60 = vpop.f32.mrf.mxu1 }
 0x327   :  { %v1128_v61 = vpop.f32.mrf.mxu0 }
 0x328   :  { %v1037_v62 = vpop.f32.mrf.mxu1 }
 0x329   :  { %v739_v63 = vpop.f32.mrf.mxu0  ;;  %v1038_v6 = vadd.f32 %v1037_v62, %v1036_v60 }
 0x32a   :  { %v1039_v2 = vpop.f32.mrf.mxu1 }
 0x32b   :  { %v1129_v4 = vpop.f32.mrf.mxu0  ;;  %v740_v14 = vadd.f32 %v1038_v6, %v739_v63 }
 0x32c   :  { %v1040_v5 = vpop.f32.mrf.mxu1 }
 0x32d   :  { %v1041_v7 = vadd.f32 %v1040_v5, %v1039_v2  ;;  %v742_v9 = vpop.f32.mrf.mxu0  ;;  %v763_v19 = vmul.f32 %v740_v14, %v740_v14 }
 0x32e   :  { %v1042_v11 = vpop.f32.mrf.mxu1 }
 0x32f   :  { %v743_v12 = vadd.f32 %v1041_v7, %v742_v9 }
 0x330   :  { %v1043_v13 = vpop.f32.mrf.mxu1 }
 0x331   :  { %v1044_v15 = vadd.f32 %v1043_v13, %v1042_v11  ;;  %v764_v17 = vmul.f32 %v743_v12, %v743_v12  ;;  %v754_v20 = vadd.f32 %v743_v12, %v740_v14 }
 0x332   :  { %v1045_v16 = vpop.f32.mrf.mxu1 }
 0x333   :  { %v748_v18 = vadd.f32 %v1128_v61, %v1044_v15  ;;  %v767_v23 = vadd.f32 %v764_v17, %v763_v19 }
 0x334   :  { %v1046_v1 = vpop.f32.mrf.mxu1 }
 0x335   :  { %v765_v21 = vmul.f32 %v748_v18, %v748_v18  ;;  %v1047_v22 = vadd.f32 %v1046_v1, %v1045_v16  ;;  %v755_v24 = vadd.f32 %v754_v20, %v748_v18 }
 0x337   :  { %v751_v25 = vadd.f32 %v1129_v4, %v1047_v22  ;;  %v768_v26 = vadd.f32 %v767_v23, %v765_v21 }
 0x339   :  { %v756_v27 = vadd.f32 %v755_v24, %v751_v25  ;;  %v766_v29 = vmul.f32 %v751_v25, %v751_v25 }
 0x33b   :  { %v757_v30 = vrot.slane %v756_v27, 4  ;;  %v769_v31 = vadd.f32 %v768_v26, %v766_v29 }
 0x33d   :  { %v758_v54 = vadd.f32 %v757_v30, %v756_v27  ;;  %v770_v32 = vrot.slane %v769_v31, 4 }
 0x33f   :  { %v759_v33 = vrot.slane %v758_v54, 2  ;;  %v771_v56 = vadd.f32 %v770_v32, %v769_v31 }
 0x341   :  { %v760_v34 = vadd.f32 %v759_v33, %v758_v54  ;;  %v772_v59 = vrot.slane %v771_v56, 2 }
 0x343   :  { %v761_v35 = vrot.slane %v760_v34, 1  ;;  %v773_v3 = vadd.f32 %v772_v59, %v771_v56 }
 0x345   :  { %v774_v36 = vrot.slane %v773_v3, 1  ;;  %v762_v37 = vadd.f32 %v761_v35, %v760_v34 }
 0x347   :  { %v775_v38 = vadd.f32 %v774_v36, %v773_v3 }
 0x349   :  { %v776_v39 = vsel %vm91_vm4, %v762_v37, %v775_v38 }
 0x34a   :  { %1163 = vmatmul.mubr.f32.vlgmr.msra.gmra.mxu1 %v776_v39 }
 0x40a   :  { %v859_v40 = vpop.f32.mrf.mxu1 }
 0x40b   :  { %v863_v41 = vmul.f32 0.001953125, %v859_v40 }
 0x40c   :  { %v1164_v42 = vpop.f32.mrf.mxu1 }
 0x40d   :  { %v864_v43 = vmul.f32 %v863_v41, %v863_v41 }
 0x40f   :  { %v866_v44 = vrot.slane %v864_v43, 7 }
 0x411   :  { %v868_v10 = vsub.f32 %v863_v41, %v866_v44 }
 0x413   :  { %v869_v45 = vmax.f32 %v868_v10, 0.0 }
 0x415   :  { %v871_v28 = vadd.f32 1e-05, %v869_v45 }
 0x417   :  { %1215 = vrsqrt.f32 %v871_v28 }
 0x424   :  { %v1216_v46 = vpop.eup %1215 }
 0x425   :  { %v880_v47 = vrot.slane %v1216_v46, %v1523_v0 }
 0x427   :  { %v881_v48 = vcombine.high %v880_v47, %v880_v47 }
 0x429   :  { %v888_v50 = vrot.slane %v881_v48, %v1523_v0 }
 0x42b   :  { %v890_v51 = vmul.f32 %v888_v50, %v870_v49 }
 0x42d   :  { %v892_v53 = vmul.f32 %v890_v51, %v863_v41  ;;  %v898_v55 = vrot.slane %v890_v51, %v1530_v8 }
 0x42f   :  { %v893_v57 = vsub.f32 %v891_v52, %v892_v53  ;;  %v900_v58 = vmul.f32 %v898_v55, %v740_v14  ;;  %v901_v60 = vmul.f32 %v898_v55, %v743_v12  ;;  %v902_v61 = vmul.f32 %v898_v55, %v748_v18 }
 0x430   :  { %v903_v62 = vmul.f32 %v898_v55, %v751_v25 }
 0x431   :  { %v908_v63 = vrot.slane %v893_v57, %v1530_v8 }
 0x433   :  { %v910_v2 = vadd.f32 %v908_v63, %v900_v58  ;;  %v911_v4 = vadd.f32 %v908_v63, %v901_v60  ;;  %v912_v5 = vadd.f32 %v908_v63, %v902_v61  ;;  %v913_v6 = vadd.f32 %v908_v63, %v903_v62 }
 0x435   :  { %v914_v0 = vmax.f32 %v910_v2, 0.0  ;;  %v915_v7 = vmax.f32 %v911_v4, 0.0  ;;  %v916_v9 = vmax.f32 %v912_v5, 0.0  ;;  %v917_v11 = vmax.f32 %v913_v6, 0.0 }
 0x437   :  { %v995_v13 = vpack.c.bf16 %v915_v7, %v914_v0  ;;  %v1000_v15 = vpack.c.bf16 %v917_v11, %v916_v9 }
 0x439   :  { %996 = vst [vmem:[%s1592_s9] sm:$0xff] %v995_v13   ;;  %1002 = vst [vmem:[%s1592_s9 + $0x8] sm:$0xff] %v1000_v15  }
 0x43a   :  { %942 = vsyncpa [#allocation3], 1 }
 0x43b   :  { %943 = vsyncpa [#allocation5], 1 }

</bundles_post_ra>
